<compile_context>
chip_gen: v7x
topology: tpu7x:2x2x1
jax: 0.10.0
libtpu: 0.0.40
codegen_flags: <defaults>
</compile_context>

<pallas_src>
import functools

import jax
import jax.numpy as jnp
from jax.experimental import pallas as pl
from jax.experimental.pallas import tpu as pltpu


# ----------------------------------------------------------------------------
# Kernel
# ----------------------------------------------------------------------------
def _relation_kernel(edge_type_ref, c_ijk_ref, w_ref, g_init_ref, wrel_t_ref,
                     out_ref, acc_ref, cnt_ref, *, tile_r):
    e_step = pl.program_id(1)

    @pl.when(e_step == 0)
    def _():
        acc_ref[...] = jnp.zeros_like(acc_ref)
        cnt_ref[...] = jnp.zeros_like(cnt_ref)

    # h_ijk tile on the MXU: bf16 inputs, f32 accumulation.  [TE, out]
    h_ijk = jnp.dot(c_ijk_ref[...], w_ref[...],
                    preferred_element_type=jnp.float32)

    # Build the one-hot scatter tile in-register (no [R, E] matrix in HBM).
    tile_e = edge_type_ref.shape[1]
    r_base = pl.program_id(0) * tile_r
    rel_ids = r_base + jax.lax.broadcasted_iota(jnp.int32, (tile_r, tile_e), 0)
    onehot = (edge_type_ref[...] == rel_ids).astype(jnp.float32)     # [TR, TE]

    # Scatter-add this E tile into the resident f32 accumulators.
    acc_ref[...] += jnp.dot(onehot, h_ijk, preferred_element_type=jnp.float32)
    cnt_ref[...] += jnp.sum(onehot, axis=1, keepdims=True)

    @pl.when(e_step == pl.num_programs(1) - 1)
    def _():
        # scatter_mean: relations with no edges stay 0 (acc is 0 there).
        inv = pl.reciprocal(jnp.maximum(cnt_ref[...], 1.0), approx=True)
        g = acc_ref[...] * inv
        g_lin = jnp.dot(g_init_ref[...].astype(jnp.bfloat16), wrel_t_ref[...],
                        preferred_element_type=jnp.float32)
        out_ref[...] = (g_lin + g).astype(out_ref.dtype)


# ----------------------------------------------------------------------------
# Wrapper
# ----------------------------------------------------------------------------
def relation_layer(g_initial, c_ijk, edge_type, w, wrel_weight,
                   *, tile_r=8, tile_e=256):
    """g_prime = g_initial @ wrel_weight.T + scatter_mean(c_ijk @ w, edge_type)."""
    num_rel, in_size = g_initial.shape
    num_edges = c_ijk.shape[0]
    out_size = w.shape[1]

    # Pad R / E to tile multiples.  Padded edges carry an out-of-range type so
    # they match no relation row; padded relation rows are sliced off at the end.
    r_pad = (-num_rel) % tile_r
    e_pad = (-num_edges) % tile_e
    r_tot, e_tot = num_rel + r_pad, num_edges + e_pad

    g_init_p = jnp.pad(g_initial, ((0, r_pad), (0, 0))).astype(jnp.float32)
    c_ijk_p = jnp.pad(c_ijk, ((0, e_pad), (0, 0))).astype(jnp.bfloat16)
    sentinel = r_tot                       # matches no relation id in [0, r_tot)
    et_p = jnp.pad(edge_type.astype(jnp.int32), (0, e_pad),
                   constant_values=sentinel).reshape(1, e_tot)

    w_bf = w.astype(jnp.bfloat16)                    # [in, out]
    wrel_t = wrel_weight.T.astype(jnp.bfloat16)      # [in, out]

    grid = (r_tot // tile_r, e_tot // tile_e)
    kernel = functools.partial(_relation_kernel, tile_r=tile_r)

    out = pl.pallas_call(
        kernel,
        out_shape=jax.ShapeDtypeStruct((r_tot, out_size), jnp.float32),
        grid_spec=pltpu.PrefetchScalarGridSpec(
            num_scalar_prefetch=0,
            grid=grid,
            in_specs=[
                pl.BlockSpec((1, tile_e), lambda r, e: (0, e)),          # edge_type
                pl.BlockSpec((tile_e, in_size), lambda r, e: (e, 0)),    # c_ijk
                pl.BlockSpec((in_size, out_size), lambda r, e: (0, 0)),  # W (resident)
                pl.BlockSpec((tile_r, in_size), lambda r, e: (r, 0)),    # g_initial
                pl.BlockSpec((in_size, out_size), lambda r, e: (0, 0)),  # Wrel^T (resident)
            ],
            out_specs=pl.BlockSpec((tile_r, out_size), lambda r, e: (r, 0)),
            scratch_shapes=[
                pltpu.VMEM((tile_r, out_size), jnp.float32),   # scatter-sum acc
                pltpu.VMEM((tile_r, 1), jnp.float32),          # per-relation counts
            ],
        ),
        compiler_params=pltpu.CompilerParams(
            dimension_semantics=("parallel", "arbitrary"),
            # Tile footprint is small; this explicit bound is safe on v5e/v6e
            # and well under v7x's 64 MiB VMEM.
            vmem_limit_bytes=16 * 1024 * 1024,
        ),
    )(et_p, c_ijk_p, w_bf, g_init_p, wrel_t)

    return out[:num_rel]


# ----------------------------------------------------------------------------
# Pure-JAX reference (same bf16 matmul precision as the kernel)
# ----------------------------------------------------------------------------
def relation_layer_ref(g_initial, c_ijk, edge_type, w, wrel_weight):
    num_rel = g_initial.shape[0]
    h = jnp.dot(c_ijk.astype(jnp.bfloat16), w.astype(jnp.bfloat16),
                preferred_element_type=jnp.float32)
    onehot = (edge_type[None, :] == jnp.arange(num_rel)[:, None]).astype(jnp.float32)
    seg = onehot @ h
    cnt = onehot.sum(axis=1, keepdims=True)
    g = seg / jnp.maximum(cnt, 1.0)
    g_lin = jnp.dot(g_initial.astype(jnp.bfloat16),
                    wrel_weight.T.astype(jnp.bfloat16),
                    preferred_element_type=jnp.float32)
    return g_lin + g


# ----------------------------------------------------------------------------
# Example run
# ----------------------------------------------------------------------------
if __name__ == "__main__":
    num_rel, num_edges = 16, 512
    in_size, out_size = 64, 128

    key = jax.random.PRNGKey(0)
    k0, k1, k2, k3, k4 = jax.random.split(key, 5)

    g_initial = jax.random.normal(k0, (num_rel, in_size), jnp.float32)
    c_ijk = jax.random.normal(k1, (num_edges, in_size), jnp.float32)
    edge_type = jnp.concatenate([
        jnp.arange(num_rel, dtype=jnp.int32),   # every relation appears >= once
        jax.random.randint(k2, (num_edges - num_rel,), 0, num_rel,
                           dtype=jnp.int32)])

    # init_params(): W ~ xavier_uniform(gain=1.414), weights_rel.weight ~ xavier_normal.
    gain = 1.414
    bound = gain * (6.0 / (in_size + out_size)) ** 0.5
    W = jax.random.uniform(k3, (in_size, out_size), jnp.float32, -bound, bound)
    std = gain * (2.0 / (in_size + out_size)) ** 0.5
    wrel_weight = std * jax.random.normal(k4, (out_size, in_size), jnp.float32)

    g_prime = relation_layer(g_initial, c_ijk, edge_type, W, wrel_weight)
    jax.block_until_ready(g_prime)

    ref = relation_layer_ref(g_initial, c_ijk, edge_type, W, wrel_weight)
    assert g_prime.shape == (num_rel, out_size)
    assert jnp.allclose(g_prime, ref, rtol=2e-2, atol=2e-2), \
        float(jnp.max(jnp.abs(g_prime - ref)))
    print("KERNEL_OK")
</pallas_src>

<mosaic_0001>
module attributes {stable_mosaic.version = 11 : i64} {
  func.func @_relation_kernel(%arg0: i32, %arg1: i32, %arg2: memref<1x256xi32, #tpu.memory_space<vmem>>, %arg3: memref<256x64xbf16, #tpu.memory_space<vmem>>, %arg4: memref<64x128xbf16, #tpu.memory_space<vmem>>, %arg5: memref<8x64xf32, #tpu.memory_space<vmem>>, %arg6: memref<64x128xbf16, #tpu.memory_space<vmem>>, %arg7: memref<8x128xf32, #tpu.memory_space<vmem>>, %arg8: memref<8x128xf32, #tpu.memory_space<vmem>>, %arg9: memref<8x1xf32, #tpu.memory_space<vmem>>) attributes {dimension_semantics = [#tpu.dimension_semantics<parallel>, #tpu.dimension_semantics<arbitrary>], iteration_bounds = array<i64: 2, 2>, scalar_prefetch = 0 : i64, scratch_operands = 2 : i64, tpu.core_type = #tpu.core_type<tc>, window_params = [{transform_indices = @transform_0, window_bounds = array<i64: 1, 256>}, {transform_indices = @transform_1, window_bounds = array<i64: 256, 64>}, {pipeline_mode = #tpu.pipeline_mode<synchronous>, transform_indices = @transform_2, window_bounds = array<i64: 64, 128>}, {transform_indices = @transform_3, window_bounds = array<i64: 8, 64>}, {pipeline_mode = #tpu.pipeline_mode<synchronous>, transform_indices = @transform_4, window_bounds = array<i64: 64, 128>}, {transform_indices = @transform_5, window_bounds = array<i64: 8, 128>}]} {
    %c0_i32 = arith.constant 0 : i32
    %0 = arith.cmpi eq, %arg1, %c0_i32 : i32
    %1 = arith.extui %0 : i1 to i32
    %c0_i32_0 = arith.constant 0 : i32
    %2 = arith.cmpi ne, %1, %c0_i32_0 : i32
    scf.if %2 {
      %cst_17 = arith.constant 0.000000e+00 : f32
      %27 = vector.broadcast %cst_17 : f32 to vector<8x128xf32>
      %c0_18 = arith.constant 0 : index
      %c0_19 = arith.constant 0 : index
      %28 = vector.load %arg8[%c0_18, %c0_19] : memref<8x128xf32, #tpu.memory_space<vmem>>, vector<8x128xf32>
      tpu.vector_store %arg8[%c0_18, %c0_19], %27 {strides = array<i32>} : memref<8x128xf32, #tpu.memory_space<vmem>>, vector<8x128xf32>,
      %cst_20 = arith.constant 0.000000e+00 : f32
      %29 = vector.broadcast %cst_20 : f32 to vector<8x1xf32>
      %c0_21 = arith.constant 0 : index
      %c0_22 = arith.constant 0 : index
      %30 = vector.load %arg9[%c0_21, %c0_22] : memref<8x1xf32, #tpu.memory_space<vmem>>, vector<8x1xf32>
      tpu.vector_store %arg9[%c0_21, %c0_22], %29 {strides = array<i32>} : memref<8x1xf32, #tpu.memory_space<vmem>>, vector<8x1xf32>,
    } else {
    }
    %c0 = arith.constant 0 : index
    %c0_1 = arith.constant 0 : index
    %3 = vector.load %arg3[%c0, %c0_1] : memref<256x64xbf16, #tpu.memory_space<vmem>>, vector<256x64xbf16>
    %c0_2 = arith.constant 0 : index
    %c0_3 = arith.constant 0 : index
    %4 = vector.load %arg4[%c0_2, %c0_3] : memref<64x128xbf16, #tpu.memory_space<vmem>>, vector<64x128xbf16>
    %cst = arith.constant dense<0.000000e+00> : vector<256x128xf32>
    %5 = tpu.matmul %3, %4, %cst {dimension_numbers = #tpu.dot_dimension_numbers<[1], [0], [0], [1], [0, 0, 1, 1], [], []>} : vector<256x64xbf16>, vector<64x128xbf16>, vector<256x128xf32> -> vector<256x128xf32>
    %c8_i32 = arith.constant 8 : i32
    %6 = arith.muli %arg0, %c8_i32 : i32
    %7 = tpu.iota {dimensions = array<i32: 0>} : vector<8x256xi32>
    %8 = vector.broadcast %6 : i32 to vector<8x256xi32>
    %9 = arith.addi %8, %7 : vector<8x256xi32>
    %c0_4 = arith.constant 0 : index
    %c0_5 = arith.constant 0 : index
    %10 = vector.load %arg2[%c0_4, %c0_5] : memref<1x256xi32, #tpu.memory_space<vmem>>, vector<1x256xi32>
    %11 = vector.broadcast %10 : vector<1x256xi32> to vector<8x256xi32>
    %12 = arith.cmpi eq, %11, %9 : vector<8x256xi32>
    %13 = arith.extui %12 : vector<8x256xi1> to vector<8x256xi32>
    %14 = arith.sitofp %13 : vector<8x256xi32> to vector<8x256xf32>
    %c0_6 = arith.constant 0 : index
    %c0_7 = arith.constant 0 : index
    %15 = vector.load %arg8[%c0_6, %c0_7] : memref<8x128xf32, #tpu.memory_space<vmem>>, vector<8x128xf32>
    %cst_8 = arith.constant dense<0.000000e+00> : vector<8x128xf32>
    %16 = tpu.matmul %14, %5, %cst_8 {dimension_numbers = #tpu.dot_dimension_numbers<[1], [0], [0], [1], [0, 0, 1, 1], [], []>} : vector<8x256xf32>, vector<256x128xf32>, vector<8x128xf32> -> vector<8x128xf32>
    %17 = arith.addf %15, %16 : vector<8x128xf32>
    %c0_9 = arith.constant 0 : index
    %c0_10 = arith.constant 0 : index
    %18 = vector.load %arg8[%c0_9, %c0_10] : memref<8x128xf32, #tpu.memory_space<vmem>>, vector<8x128xf32>
    tpu.vector_store %arg8[%c0_9, %c0_10], %17 {strides = array<i32>} : memref<8x128xf32, #tpu.memory_space<vmem>>, vector<8x128xf32>,
    %c0_11 = arith.constant 0 : index
    %c0_12 = arith.constant 0 : index
    %19 = vector.load %arg9[%c0_11, %c0_12] : memref<8x1xf32, #tpu.memory_space<vmem>>, vector<8x1xf32>
    %cst_13 = arith.constant dense<0.000000e+00> : vector<8xf32>
    %20 = vector.multi_reduction <add>, %14, %cst_13 [1] : vector<8x256xf32> to vector<8xf32>
    %21 = vector.shape_cast %20 : vector<8xf32> to vector<8x1xf32>
    %22 = arith.addf %19, %21 : vector<8x1xf32>
    %c0_14 = arith.constant 0 : index
    %c0_15 = arith.constant 0 : index
    %23 = vector.load %arg9[%c0_14, %c0_15] : memref<8x1xf32, #tpu.memory_space<vmem>>, vector<8x1xf32>
    tpu.vector_store %arg9[%c0_14, %c0_15], %22 {strides = array<i32>} : memref<8x1xf32, #tpu.memory_space<vmem>>, vector<8x1xf32>,
    %c1_i32 = arith.constant 1 : i32
    %24 = arith.cmpi eq, %arg1, %c1_i32 : i32
    %25 = arith.extui %24 : i1 to i32
    %c0_i32_16 = arith.constant 0 : i32
    %26 = arith.cmpi ne, %25, %c0_i32_16 : i32
    scf.if %26 {
      %c0_17 = arith.constant 0 : index
      %c0_18 = arith.constant 0 : index
      %27 = vector.load %arg9[%c0_17, %c0_18] : memref<8x1xf32, #tpu.memory_space<vmem>>, vector<8x1xf32>
      %cst_19 = arith.constant 1.000000e+00 : f32
      %28 = vector.broadcast %cst_19 : f32 to vector<8x1xf32>
      %29 = arith.maximumf %27, %28 : vector<8x1xf32>
      %30 = tpu.reciprocal %29 {approx = true} : vector<8x1xf32> -> vector<8x1xf32>
      %c0_20 = arith.constant 0 : index
      %c0_21 = arith.constant 0 : index
      %31 = vector.load %arg8[%c0_20, %c0_21] : memref<8x128xf32, #tpu.memory_space<vmem>>, vector<8x128xf32>
      %32 = vector.broadcast %30 : vector<8x1xf32> to vector<8x128xf32>
      %33 = arith.mulf %31, %32 : vector<8x128xf32>
      %c0_22 = arith.constant 0 : index
      %c0_23 = arith.constant 0 : index
      %34 = vector.load %arg5[%c0_22, %c0_23] : memref<8x64xf32, #tpu.memory_space<vmem>>, vector<8x64xf32>
      %35 = arith.truncf %34 : vector<8x64xf32> to vector<8x64xbf16>
      %c0_24 = arith.constant 0 : index
      %c0_25 = arith.constant 0 : index
      %36 = vector.load %arg6[%c0_24, %c0_25] : memref<64x128xbf16, #tpu.memory_space<vmem>>, vector<64x128xbf16>
      %cst_26 = arith.constant dense<0.000000e+00> : vector<8x128xf32>
      %37 = tpu.matmul %35, %36, %cst_26 {dimension_numbers = #tpu.dot_dimension_numbers<[1], [0], [0], [1], [0, 0, 1, 1], [], []>} : vector<8x64xbf16>, vector<64x128xbf16>, vector<8x128xf32> -> vector<8x128xf32>
      %38 = arith.addf %37, %33 : vector<8x128xf32>
      %c0_27 = arith.constant 0 : index
      %c0_28 = arith.constant 0 : index
      %39 = vector.load %arg7[%c0_27, %c0_28] : memref<8x128xf32, #tpu.memory_space<vmem>>, vector<8x128xf32>
      tpu.vector_store %arg7[%c0_27, %c0_28], %38 {strides = array<i32>} : memref<8x128xf32, #tpu.memory_space<vmem>>, vector<8x128xf32>,
    } else {
    }
    return
  }
  func.func @transform_0(%arg0: i32, %arg1: i32) -> (i32, i32) {
    %c0_i32 = arith.constant 0 : i32
    %c0_i32_0 = arith.constant 0 : i32
    return %c0_i32, %arg1 : i32, i32
  }
  func.func @transform_1(%arg0: i32, %arg1: i32) -> (i32, i32) {
    %c0_i32 = arith.constant 0 : i32
    %c0_i32_0 = arith.constant 0 : i32
    return %arg1, %c0_i32 : i32, i32
  }
  func.func @transform_2(%arg0: i32, %arg1: i32) -> (i32, i32) {
    %c0_i32 = arith.constant 0 : i32
    %c0_i32_0 = arith.constant 0 : i32
    %c0_i32_1 = arith.constant 0 : i32
    return %c0_i32, %c0_i32_0 : i32, i32
  }
  func.func @transform_3(%arg0: i32, %arg1: i32) -> (i32, i32) {
    %c0_i32 = arith.constant 0 : i32
    %c0_i32_0 = arith.constant 0 : i32
    return %arg0, %c0_i32 : i32, i32
  }
  func.func @transform_4(%arg0: i32, %arg1: i32) -> (i32, i32) {
    %c0_i32 = arith.constant 0 : i32
    %c0_i32_0 = arith.constant 0 : i32
    %c0_i32_1 = arith.constant 0 : i32
    return %c0_i32, %c0_i32_0 : i32, i32
  }
  func.func @transform_5(%arg0: i32, %arg1: i32) -> (i32, i32) {
    %c0_i32 = arith.constant 0 : i32
    %c0_i32_0 = arith.constant 0 : i32
    return %arg0, %c0_i32 : i32, i32
  }
}

</mosaic_0001>

<bundles_post_ra>
// kernel: tpu_custom_call.1
= control target key start
LH: loop header
LB: loop body
LE: loop exit
PB: predicated region body
PF: predicated region fallthrough
CT: control target
= control target key end

     0   :  { %10 = vsyncpa [#allocation5], 0  ;;  %s1616_s0 = inlined_call_operand.vmem [shape: s32[1,512], index: 0, kind: input, shape index: {}]   ;;  %s1617_s1 = inlined_call_operand.vmem [shape: bf16[512,64], index: 1, kind: input, shape index: {}]   ;;  %s1618_s2 = inlined_call_operand.vmem [shape: bf16[64,128], index: 2, kind: input, shape index: {}]   ;;  %s1619_s3 = inlined_call_operand.vmem [shape: f32[16,64], index: 3, kind: input, shape index: {}]   ;;  %s1620_s4 = inlined_call_operand.vmem [shape: bf16[64,128], index: 4, kind: input, shape index: {}]   ;;  %s1621_s5 = inlined_call_operand.hbm [shape: f32[16,128], index: 5, kind: output, shape index: {}]  }
   0x1   :  { %12 = vsyncpa [#allocation5 + $0x1], 0  ;;  %s1383_s18 = smov 0   ;;  %s1385_s19 = smov 0  }
   0x2   :  { %s1387_s20 = smov 0   ;;  %s1389_s21 = smov 0  }
   0x3   :  { %s1391_s22 = smov 0   ;;  %s1393_s23 = smov 0  }
   0x4   :  { %s1395_s24 = smov 0   ;;  %s1397_s25 = smov 0  }
   0x5 LB: > { %1626 = sst [smem:[#allocation7_spill]] %s1336_s23  ;;  %s932_s26 = sadd.s32 4294967295, %s1344_s25   ;;  %s1344_s25 = sphi %s1397_s25, %s18_s25   ;;  %s1340_s24 = sphi %s1395_s24, %s1636_s24   ;;  %s1336_s23 = sphi %s1393_s23, %s1635_s23   ;;  %s1332_s22 = sphi %s1391_s22, %s1634_s22   ;;  %s1328_s21 = sphi %s1389_s21, %s1633_s21   ;;  %s1324_s20 = sphi %s1387_s20, %s1639_s20   ;;  %s1320_s19 = sphi %s1385_s19, %s1638_s19   ;;  %s1316_s18 = sphi %s1383_s18, %s1637_s18  }
   0x6   : > { %1627 = sst [smem:[#allocation8_spill]] %s1340_s24  ;;  %s933_s27 = sadd.s32 4294967294, %s1344_s25  }
   0x7   : > { %s27_s28 = sadd.s32 1, %s1336_s23  ;;  %s30_s29 = sadd.s32 1, %s1340_s24 }
   0x8   : > { %p28_p0 = scmp.ge.s32.totalorder %s27_s28, 2  ;;  %p167_p1 = scmp.ne.s32.totalorder %s1324_s20, %s1320_s19 }
   0x9   : > { %p168_p2 = scmp.eq.s32.totalorder %s932_s26, 3  ;;  %p173_p4 = scmp.ne.s32.totalorder %s1320_s19, %s1316_s18 }
   0xa   : > { %s1641_s28 = smov (%p28_p0, %s27_s28), 0  ;;  %s1643_s29 = smov (!%p28_p0, %s30_s29), %s1340_s24 }
   0xb   : > { %1628 = sst [smem:[#allocation9_spill]] %s1641_s28  ;;  %p1432_p3 = por %p168_p2, %p167_p1 }
   0xc   : > { %p32_p5 = scmp.ge.s32.totalorder %s1643_s29, 2  ;;  %p174_p6 = scmp.eq.s32.totalorder %s933_s27, 3 }
   0xd   : > { %p936_p7 = scmp.ge.s32.totalorder %s1344_s25, 1  ;;  %p222_p8 = scmp.lt.s32.totalorder %s1344_s25, 5 }
   0xe   : > { %s1645_s29 = smov (%p32_p5, %s1643_s29), 0  ;;  %p1442_p9 = por %p174_p6, %p173_p4 }
   0xf   : > { %1630 = sst [smem:[#allocation10_spill]] %s1645_s29  ;;  %p223_p10 = pnand %p936_p7, %p222_p8 }
  0x10   : > { %s154_s7 = ssub.s32 %s1340_s24, %s1645_s29  ;;  %s157_s8 = sadd.s32 1, %s1324_s20 }
  0x11   : > { %p155_p11 = scmp.eq.s32.totalorder %s154_s7, 0  ;;  %226 = sbr.rel (%p223_p10) target bundleno = 555 (0x22b), region = 40 }
  0x12   : > { %s1622_s10 = sand.u32 (!%p223_p10), 1, %s1320_s19   ;;  %s938_s11 = sshll.u32 (!%p223_p10), %s1328_s21, 1 }
  0x13   : > { %s1450_s9 = scalar_select %p155_p11, %s1324_s20, %s157_s8  }
  0x14   : > { %s1456_s12 = sshll.u32 (!%p223_p10), %s1622_s10, 3  ;;  %p259_p12 = scmp.lt.s32.totalorder (!%p223_p10), %s938_s11, 3 }
  0x15   : > { %s939_s13 = sshll.u32 (!%p223_p10), %s1328_s21, 5  ;;  %p269_p0 = scmp.lt.s32.totalorder (!%p223_p10), %s1332_s22, 1 }
  0x16   : > { %p264_p13 = scmp.lt.s32.totalorder (!%p223_p10), %s939_s13, 63  ;;  %s257_s23 = scalar_lea.vmem (!%p223_p10), [#allocation4], %s1456_s12 }
  0x17   : > { %p942_p1 = scmp.ne.s32.totalorder (!%p223_p10), %s1328_s21, 0 }
  0x18   : > { %s1647_s11 = smov (!%p259_p12, %s938_s11), 3  ;;  %s1649_s13 = smov (!%p264_p13, %s939_s13), 63 }
  0x19   : > { %s261_s16 = scalar_lea.vmem %s1616_s0, %s1647_s11  ;;  %s940_s26 = sshll.u32 %s1649_s13, 2  ;;  %vm279_vm0 = vcmask (!%p942_p1), 7168   ;;  %v1346_v0 = vmov (!%p942_p1), 0.0  }
  0x1a   : > { %s270_s17 = scalar_select %p269_p0, %s1332_s22, 1 }
  0x1b   : > { %s1470_s8 = scalar_lea.vmem %s1617_s1, %s940_s26  ;;  %277 = sbr.rel (%p942_p1) target bundleno = 34 (0x22), region = 44  ;;  %278 = vst [vmem:[#allocation2] sm:$0xff] (!%p942_p1), %v1346_v0  ;;  %280 = vst.msk [vmem:[#allocation3] sm:$0xff] (!%p942_p1), %vm279_vm0, %v1346_v0 }
  0x1c   : > { %s941_s10 = sshll.u32 %s270_s17, 3 }
  0x1d   : > { %s1475_s24 = scalar_lea.vmem %s1619_s3, %s941_s10 }
  0x22 PF: > { %v1223_v1 = vld [vmem:[%s1618_s2] sm:$0xff]   ;;  %v1224_v2 = vld [vmem:[%s1618_s2 + $0x8] sm:$0xff]   ;;  %v1225_v3 = vld [vmem:[%s1618_s2 + $0x10] sm:$0xff]   ;;  %vm425_vm1 = vcmask 523264   ;;  %v636_v21 = vlaneseq  ;;  %s979_s27 = sshll.u32 %s1332_s22, 3  ;;  %v1347_v30 = vmov 1.0  }
  0x23   : > { %1054 = vmatprep.subr.bf16.mxu0 %v1223_v1  ;;  %1138 = vmatprep.subr.bf16.mxu1 %v1223_v1  ;;  %v1227_v4 = vld [vmem:[%s1470_s8] sm:$0xff]   ;;  %v1226_v6 = vld [vmem:[%s1618_s2 + $0x18] sm:$0xff]   ;;  %v1229_v7 = vld [vmem:[%s1470_s8 + $0x8] sm:$0xff]   ;;  %v638_v24 = vstv %s979_s27  ;;  %v1348_v31 = vmov 0.0   ;;  %vm733_vm4 = vcmask 7168   ;;  %p984_p2 = scmp.ne.s32.totalorder %s1328_s21, 1 }
  0x24   : > { %1055 = vmatpush3.bf16.msra.mxu0 %v1223_v1  ;;  %1142 = vmatpush3.bf16.msra.mxu1 %v1223_v1  ;;  %v1228_v5 = vld [vmem:[%s1470_s8 + $0x40] sm:$0xff]   ;;  %v1230_v8 = vld [vmem:[%s1470_s8 + $0x48] sm:$0xff]   ;;  %v1231_v9 = vld [vmem:[%s1470_s8 + $0x10] sm:$0xff]   ;;  %v637_v22 = vshrl.u32 %v636_v21, 7  ;;  %vm1350_vm5 = vmmov (!%p984_p2), 0  }
  0x25   : > { %1056 = vmatprep.subr.bf16.mxu0 %v1224_v2  ;;  %1139 = vmatprep.subr.bf16.mxu1 %v1224_v2  ;;  %v1232_v10 = vld [vmem:[%s1470_s8 + $0x50] sm:$0xff]   ;;  %v1233_v11 = vld [vmem:[%s1470_s8 + $0x18] sm:$0xff]   ;;  %v1235_v13 = vld [vmem:[%s1470_s8 + $0x20] sm:$0xff]  }
  0x26   : > { %1062 = vmatprep.mubr.msk.bf16.mxu0 %vm425_vm1, %v1227_v4  ;;  %1078 = vmatprep.mubr.msk.bf16.mxu1 %vm425_vm1, %v1228_v5  ;;  %v1234_v12 = vld [vmem:[%s1470_s8 + $0x58] sm:$0xff]   ;;  %v1236_v14 = vld [vmem:[%s1470_s8 + $0x60] sm:$0xff]   ;;  %v1237_v15 = vld [vmem:[%s1470_s8 + $0x28] sm:$0xff]   ;;  %v647_v23 = vsub.s32 1, %v637_v22  ;;  %v643_v26 = vsub.s32 0, %v637_v22  ;;  %v1529_v27 = vadd.s32 %v638_v24, %v637_v22 }
  0x27   : > { %v1238_v16 = vld [vmem:[%s1470_s8 + $0x68] sm:$0xff]   ;;  %v1239_v17 = vld [vmem:[%s1470_s8 + $0x30] sm:$0xff]   ;;  %v1241_v19 = vld [vmem:[%s1470_s8 + $0x38] sm:$0xff]  }
  0x28   : > { %1057 = vmatpush3.bf16.msra.mxu0 %v1224_v2  ;;  %1143 = vmatpush3.bf16.msra.mxu1 %v1224_v2  ;;  %v1240_v18 = vld [vmem:[%s1470_s8 + $0x70] sm:$0xff]   ;;  %v1242_v20 = vld [vmem:[%s1470_s8 + $0x78] sm:$0xff]   ;;  %v640_v25 = vld [vmem:[%s261_s16] sm:$0x3] }
  0x29   : > { %1058 = vmatprep.subr.bf16.mxu0 %v1225_v3  ;;  %1140 = vmatprep.subr.bf16.mxu1 %v1225_v3  ;;  %v648_v28 = vrot.slane %v640_v25, %v647_v23  ;;  %v1531_v29 = vrot.slane %v640_v25, %v643_v26  ;;  %v655_v23 = vld [vmem:[#allocation2] sm:$0xff] }
  0x2b   : > { %vm650_vm2 = vcmp.eq.s32.totalorder %v648_v28, %v1529_v27  ;;  %vm649_vm3 = vcmp.eq.s32.totalorder %v1531_v29, %v1529_v27  ;;  %v1244_v28 = vld [vmem:[%s1620_s4] sm:$0xff] (!%p984_p2)   ;;  %v1349_v27 = vmov (!%p984_p2), 0.0   ;;  %v1245_v29 = vld [vmem:[%s1620_s4 + $0x8] sm:$0xff] (!%p984_p2)  }
  0x2c   : > { %1059 = vmatpush3.bf16.msra.mxu0 %v1225_v3  ;;  %1144 = vmatpush3.bf16.msra.mxu1 %v1225_v3  ;;  %v980_v32 = vsel %vm649_vm3, 1.0, %v1348_v31  ;;  %v981_v33 = vsel %vm650_vm2, 1.0, %v1348_v31 }
  0x2d   : > { %1060 = vmatprep.subr.bf16.mxu0 %v1226_v6  ;;  %1141 = vmatprep.subr.bf16.mxu1 %v1226_v6  ;;  %v729_v34 = vadd.f32 %v981_v33, %v980_v32  ;;  %v1246_v33 = vld [vmem:[%s1620_s4 + $0x10] sm:$0xff] (!%p984_p2)  }
  0x2f   : > { %730 = vadd.xlane.f32.xlu0 %v729_v34  ;;  %v1247_v34 = vld [vmem:[%s1620_s4 + $0x18] sm:$0xff] (!%p984_p2)  }
  0x30   : > { %1061 = vmatpush3.bf16.msra.mxu0 %v1226_v6  ;;  %1145 = vmatpush3.bf16.msra.mxu1 %v1226_v6 }
  0x31   : > { %1094 = vmatprep.subr.bf16.mxu0 (!%p984_p2), %v1349_v27 }
  0x33   : > { %1063 = vmatmul.mubr.msk.bf16.vlgmr.msra.gmra.mrb[0].mxu0 %vm425_vm1, %v1229_v7  ;;  %1079 = vmatmul.mubr.msk.bf16.vlgmr.msra.gmra.mrb[0].mxu1 %vm425_vm1, %v1230_v8 }
  0x34   : > { %1066 = vmatprep.mubr.msk.bf16.mxu0 %vm425_vm1, %v1231_v9  ;;  %1082 = vmatprep.mubr.msk.bf16.mxu1 %vm425_vm1, %v1232_v10 }
  0x35   : > { %1095 = vmatpush3.bf16.msra.mxu0 (!%p984_p2), %v1244_v28 }
  0x36   : > { %1096 = vmatprep.subr.bf16.mxu0 (!%p984_p2), %v1349_v27 }
  0x39   : > { %1097 = vmatpush3.bf16.msra.mxu0 (!%p984_p2), %v1245_v29 }
  0x3a   : > { %1098 = vmatprep.subr.bf16.mxu0 (!%p984_p2), %v1349_v27 }
  0x3b   : > { %1067 = vmatmul.mubr.msk.bf16.gmra.mrb[4].mxu0 %vm425_vm1, %v1233_v11  ;;  %1083 = vmatmul.mubr.msk.bf16.gmra.mrb[4].mxu1 %vm425_vm1, %v1234_v12 }
  0x3c   : > { %1070 = vmatprep.mubr.msk.bf16.mxu0 %vm425_vm1, %v1235_v13  ;;  %1086 = vmatprep.mubr.msk.bf16.mxu1 %vm425_vm1, %v1236_v14 }
  0x3d   : > { %1099 = vmatpush3.bf16.msra.mxu0 (!%p984_p2), %v1246_v33 }
  0x3e   : > { %1100 = vmatprep.subr.bf16.mxu0 (!%p984_p2), %v1349_v27 }
  0x41   : > { %1101 = vmatpush3.bf16.msra.mxu0 (!%p984_p2), %v1247_v34 }
  0x43   : > { %1071 = vmatmul.mubr.msk.bf16.gmra.mrb[8].mxu0 %vm425_vm1, %v1237_v15  ;;  %1087 = vmatmul.mubr.msk.bf16.gmra.mrb[8].mxu1 %vm425_vm1, %v1238_v16 }
  0x44   : > { %1074 = vmatprep.mubr.msk.bf16.mxu0 %vm425_vm1, %v1239_v17  ;;  %1090 = vmatprep.mubr.msk.bf16.mxu1 %vm425_vm1, %v1240_v18 }
  0x4b   : > { %1075 = vmatmul.mubr.msk.bf16.gmra.mrb[12].mxu0 %vm425_vm1, %v1241_v19  ;;  %1091 = vmatmul.mubr.msk.bf16.gmra.mrb[12].mxu1 %vm425_vm1, %v1242_v20  ;;  %v728_v19 = vld [vmem:[#allocation3] sm:$0xff] }
  0x4c   : > { %982 = vmatprep.mubr.msk.f32.mxu1 %vm650_vm2, %v1347_v30  ;;  %1102 = vmatprep.mubr.msk.bf16.mxu0 (!%p984_p2), %vm1350_vm5, %v1349_v27 }
  0xbc   : > { %v731_v20 = vpop.xlane.xlu0 %730 }
  0xbd   : > { %v732_v21 = vadd.f32 %v731_v20, %v728_v19 }
  0xbf   : > { %734 = vst.msk [vmem:[#allocation3] sm:$0xff] %vm733_vm4, %v732_v21 }
  0xc6   : > { %v739_v31 = vld [vmem:[#allocation3] sm:$0xff] (!%p984_p2) }
  0xc7   : > { %v740_v32 = vmax.f32 (!%p984_p2), %v739_v31, 1.0 }
  0xc9   : > { %1248 = vrcp.f32 (!%p984_p2), %v740_v32 }
 0x106   : > { %v1064_v35 = vpop.f32.mrb[0].mxu0  ;;  %v1080_v36 = vpop.f32.mrb[0].mxu1 }
 0x107   : > { %v508_v37 = vpop.f32.mrb[1].mxu0  ;;  %v572_v38 = vpop.f32.mrb[1].mxu1 }
 0x108   : > { %v1065_v39 = vpop.f32.mrb[2].mxu0  ;;  %v1081_v40 = vpop.f32.mrb[2].mxu1 }
 0x109   : > { %v1112_v41 = vpack.c.bf16 %v1065_v39, %v1064_v35  ;;  %v1110_v42 = vpack.c.bf16 %v1081_v40, %v1080_v36  ;;  %v511_v43 = vpop.f32.mrb[3].mxu0  ;;  %v575_v44 = vpop.f32.mrb[3].mxu1  ;;  %v749_v35 = vld [vmem:[%s1475_s24] sm:$0xff] (!%p984_p2) }
 0x10a   : > { %v1108_v45 = vpack.c.bf16 %v511_v43, %v508_v37  ;;  %v1106_v46 = vpack.c.bf16 %v575_v44, %v572_v38  ;;  %v750_v36 = vpack.c.bf16 (!%p984_p2), %v749_v35, %v749_v35  ;;  %v1249_v37 = vpop.eup (!%p984_p2), %1248 }
 0x10c   : > { %1107 = vmatprep.subr.bf16.mxu1 %v1106_v46  ;;  %1103 = vmatmul.mubr.msk.bf16.vlgmr.msra.gmra.mrb[0].mxu0 (!%p984_p2), %vm425_vm1, %v750_v36 }
 0x10d   : > { %1109 = vmatpush3.bf16.msra.mxu1 %v1108_v45 }
 0x10e   : > { %v1068_v47 = vpop.f32.mrb[4].mxu0  ;;  %v1084_v48 = vpop.f32.mrb[4].mxu1  ;;  %1111 = vmatprep.subr.bf16.mxu1 %v1110_v42 }
 0x10f   : > { %v524_v49 = vpop.f32.mrb[5].mxu0  ;;  %v588_v50 = vpop.f32.mrb[5].mxu1 }
 0x110   : > { %v1069_v51 = vpop.f32.mrb[6].mxu0  ;;  %v1085_v52 = vpop.f32.mrb[6].mxu1 }
 0x111   : > { %v1120_v53 = vpack.c.bf16 %v1069_v51, %v1068_v47  ;;  %v1118_v54 = vpack.c.bf16 %v1085_v52, %v1084_v48  ;;  %v527_v55 = vpop.f32.mrb[7].mxu0  ;;  %v591_v56 = vpop.f32.mrb[7].mxu1  ;;  %1113 = vmatpush3.bf16.msra.mxu1 %v1112_v41 }
 0x112   : > { %v1116_v57 = vpack.c.bf16 %v527_v55, %v524_v49  ;;  %v1114_v58 = vpack.c.bf16 %v591_v56, %v588_v50 }
 0x114   : > { %1115 = vmatprep.subr.bf16.mxu1 %v1114_v58 }
 0x115   : > { %1117 = vmatpush3.bf16.msra.mxu1 %v1116_v57 }
 0x116   : > { %v1072_v59 = vpop.f32.mrb[8].mxu0  ;;  %v1088_v60 = vpop.f32.mrb[8].mxu1  ;;  %1119 = vmatprep.subr.bf16.mxu1 %v1118_v54 }
 0x117   : > { %v540_v61 = vpop.f32.mrb[9].mxu0  ;;  %v604_v62 = vpop.f32.mrb[9].mxu1 }
 0x118   : > { %v1073_v63 = vpop.f32.mrb[10].mxu0  ;;  %v1089_v0 = vpop.f32.mrb[10].mxu1 }
 0x119   : > { %v1128_v1 = vpack.c.bf16 %v1073_v63, %v1072_v59  ;;  %v1126_v2 = vpack.c.bf16 %v1089_v0, %v1088_v60  ;;  %v543_v3 = vpop.f32.mrb[11].mxu0  ;;  %v607_v4 = vpop.f32.mrb[11].mxu1  ;;  %1121 = vmatpush3.bf16.msra.mxu1 %v1120_v53 }
 0x11a   : > { %v1124_v5 = vpack.c.bf16 %v543_v3, %v540_v61  ;;  %v1122_v6 = vpack.c.bf16 %v607_v4, %v604_v62 }
 0x11c   : > { %1123 = vmatprep.subr.bf16.mxu1 %v1122_v6 }
 0x11d   : > { %1125 = vmatpush3.bf16.msra.mxu1 %v1124_v5 }
 0x11e   : > { %v1076_v7 = vpop.f32.mrb[12].mxu0  ;;  %v1092_v8 = vpop.f32.mrb[12].mxu1  ;;  %1127 = vmatprep.subr.bf16.mxu1 %v1126_v2 }
 0x11f   : > { %v556_v9 = vpop.f32.mrb[13].mxu0  ;;  %v620_v10 = vpop.f32.mrb[13].mxu1 }
 0x120   : > { %v1077_v11 = vpop.f32.mrb[14].mxu0  ;;  %v1093_v12 = vpop.f32.mrb[14].mxu1 }
 0x121   : > { %v1136_v13 = vpack.c.bf16 %v1077_v11, %v1076_v7  ;;  %v1134_v14 = vpack.c.bf16 %v1093_v12, %v1092_v8  ;;  %v559_v15 = vpop.f32.mrb[15].mxu0  ;;  %v623_v16 = vpop.f32.mrb[15].mxu1  ;;  %1129 = vmatpush3.bf16.msra.mxu1 %v1128_v1 }
 0x122   : > { %v1132_v17 = vpack.c.bf16 %v559_v15, %v556_v9  ;;  %v1130_v18 = vpack.c.bf16 %v623_v16, %v620_v10 }
 0x124   : > { %1131 = vmatprep.subr.bf16.mxu1 %v1130_v18 }
 0x125   : > { %1133 = vmatpush3.bf16.msra.mxu1 %v1132_v17 }
 0x126   : > { %1135 = vmatprep.subr.bf16.mxu1 %v1134_v14 }
 0x129   : > { %1137 = vmatpush3.bf16.msra.mxu1 %v1136_v13 }
 0x12c   : > { %983 = vmatmul.mubr.msk.f32.vlgmr.msra.gmra.mrb[16].mxu1 %vm649_vm3, %v1347_v30  ;;  %v1351_v30 = vmov (!%p984_p2), 0  }
 0x12d   : > { %1243 = vset.pattern.permute.xlu0 (!%p984_p2), %v1351_v30 }
 0x12e   : > { %745 = vperm.xlu0 (!%p984_p2), %1243, %v1249_v37  }
 0x1ad   : > { %v746_v39 = vpop.permute.xlu0 (!%p984_p2), %745 }
 0x1df   : > { %v820_v41 = vpop.f32.mrb[0].mxu0 (!%p984_p2) }
 0x1e0   : > { %v1104_v43 = vpop.f32.mrb[1].mxu0 (!%p984_p2) }
 0x1e1   : > { %v823_v44 = vpop.f32.mrb[2].mxu0 (!%p984_p2) }
 0x1e2   : > { %v1105_v45 = vpop.f32.mrb[3].mxu0 (!%p984_p2) }
 0x1ff   : > { %v1046_v22 = vpop.f32.mrb[16].mxu1  ;;  %738 = sbr.rel (%p984_p2) target bundleno = 530 (0x212), region = 48 }
 0x200   : > { %v1047_v24 = vpop.f32.mrb[17].mxu1 }
 0x201   : > { %v1048_v25 = vadd.f32 %v1047_v24, %v1046_v22 }
 0x203   : > { %v726_v26 = vadd.f32 %v1048_v25, %v655_v23 }
 0x205   : > { %727 = vst [vmem:[#allocation2] sm:$0xff] %v726_v26 }
 0x20c   : > { %v742_v38 = vld [vmem:[#allocation2] sm:$0xff] }
 0x20d   : > { %v748_v40 = vmul.f32 %v746_v39, %v742_v38 }
 0x20f   : > { %v821_v42 = vadd.f32 %v820_v41, %v748_v40 }
 0x211   : > { %826 = vst [vmem:[%s257_s23] sm:$0xff] %v821_v42 }
 0x212 PF: > { %s991_s24 = sshll.u32 %s1332_s22, 7  ;;  %s841_s27 = sshll.u32 %s257_s23, 4  ;;  %s842_s27 = int_to_ptr.vmem [resolvable:$true] %s841_s27 }
 0x213   : > { %s1565_s26 = scalar_lea.hbm %s1621_s5, %s991_s24  ;;  %s1632_s7 = sand.u32 1, %s1320_s19  }
 0x214   : > { %s828_s13 = scalar_lea.sflag [#allocation5], %s1632_s7  ;;  %s1250_s11 = scalar_lea.vmem %s842_s27, 128 }
 0x215   : > { %p1251_p4 = scmp.ne.s32.totalorder %s842_s27, %s1250_s11  ;;  %s1352_s16 = smov [#allocation4]  }
 0x216   : > { %s1254_s8 = sshll.u32 %s1352_s16, 4  ;;  %s1255_s8 = int_to_ptr.vmem [resolvable:$false] %s1254_s8 }
 0x217   : > { %p1252_p5 = pnand %p1251_p4, %p1432_p3  ;;  %s1256_s14 = scalar_lea.vmem %s1255_s8, 256 }
 0x218   : > { %p1257_p7 = scmp.lt.s32.totalorder %s842_s27, %s1255_s8  ;;  %p1258_p8 = scmp.lt.s32.totalorder %s1256_s14, %s1250_s11 }
 0x219   : > { %p1253_p6 = pneg %p1252_p5 }
 0x21a   : > { %p1259_p10 = por %p1258_p8, %p1257_p7 }
 0x21c   : > { %p1260_p11 = pnand %p1259_p10, %p1253_p6 }
 0x21e   : > { %1263 = shalt.err (!%p1260_p11)
}
 0x21f   : > { %s1264_s22 = scalar_lea.hbm %s1565_s26, 128  ;;  %s1268_s21 = scalar_lea.hbm %s1621_s5, 256 }
 0x220   : > { %p1265_p12 = scmp.ne.s32.totalorder %s1565_s26, %s1264_s22  ;;  %p1269_p1 = scmp.lt.u32.totalorder %s1565_s26, %s1621_s5 }
 0x221   : > { %p1270_p2 = scmp.lt.u32.totalorder %s1268_s21, %s1264_s22  ;;  %p1272_p5 = scmp.lt.u32.totalorder %s1264_s22, %s1565_s26 }
 0x222   : > { %p1266_p13 = pnand %p1265_p12, %p1432_p3 }
 0x223   : > { %p1271_p4 = por %p1270_p2, %p1269_p1 }
 0x224   : > { %p1267_p0 = pneg %p1266_p13 }
 0x225   : > { %p1273_p6 = por %p1272_p5, %p1271_p4 }
 0x227   : > { %p1274_p7 = pnand %p1273_p6, %p1267_p0 }
 0x229   : > { %1277 = shalt.err (!%p1274_p7)
}
 0x22a   : > { %1146 = dma.vmem_to_hbm [thread:$0]  (%p1432_p3), %s842_s27, 128, %s1565_s26, %s828_s13  }
 0x22b PF: > { %p1152_p8 = scmp.ge.s32.totalorder %s1344_s25, 2  ;;  %s853_s28 = sand.u32 1, %s1316_s18  }
 0x22c   : > { %s854_s24 = scalar_lea.sflag [#allocation5], %s853_s28 }
 0x22d   : > { %p1149_p10 = pnand %p1152_p8, %p1442_p9 }
 0x22f   : > { %1311 = dma.done.wait (!%p1149_p10), %s854_s24, 128  }
 0x230   : > { %1313 = vsyncadd (!%p1149_p10), %s854_s24, 4294967168  ;;  %s18_s25 = sadd.s32 1, %s1344_s25   ;;  %s1633_s21 = sld [smem:[#allocation7_spill]] }
 0x231   : > { %p15_p11 = scmp.ge.s32.totalorder %s18_s25, 6   ;;  %s1634_s22 = sld [smem:[#allocation8_spill]] }
 0x232   : > { %s1635_s23 = sld [smem:[#allocation9_spill]]  ;;  %s1636_s24 = sld [smem:[#allocation10_spill]] }
 0x233   : > { %s1637_s18 = smov %s1320_s19  ;;  %s1638_s19 = smov %s1324_s20 }
 0x234   : > { %s1639_s20 = smov %s1450_s9  ;;  %17 = sbr.rel (!%p15_p11) target bundleno = 5 (0x5), region = 89 }
 0x23b   :  { %859 = vsyncpa [#allocation5], 1 }
 0x23c   :  { %861 = vsyncpa [#allocation5 + $0x1], 1 }

</bundles_post_ra>
